<compile_context>
chip_gen: v6e
topology: v6e:2x2x1
jax: 0.10.0
libtpu: 0.0.40
codegen_flags: <defaults>
</compile_context>

<pallas_src>
import functools

import jax
import jax.numpy as jnp
from jax.experimental import pallas as pl
from jax.experimental.pallas import tpu as pltpu

_LANE = 128     # vreg lane width
_SUBLANE = 8    # vreg sublane count


def _round_up(x, m):
    return ((x + m - 1) // m) * m


def _mlp_kernel(x_ref, w1_ref, b1_ref, w2_ref, b2_ref, w3_ref, b3_ref, o_ref,
                *, compute_dtype):
    # x and weights arrive already in compute_dtype (pre-cast in the wrapper /
    # prepare step).  The only in-kernel casts are on the f32 activations that
    # feed the next MXU matmul (a no-op when compute_dtype == f32).
    h = jnp.dot(x_ref[...], w1_ref[...], preferred_element_type=jnp.float32)
    h = jnp.maximum(h + b1_ref[...], 0.0)
    h = jnp.dot(h.astype(compute_dtype), w2_ref[...],
                preferred_element_type=jnp.float32)
    h = jnp.maximum(h + b2_ref[...], 0.0)
    out = jnp.dot(h.astype(compute_dtype), w3_ref[...],
                  preferred_element_type=jnp.float32)
    o_ref[...] = (out + b3_ref[...]).astype(o_ref.dtype)


def prepare_mlp_params(params, compute_dtype=jnp.float32):
    """One-time packing of the MLP parameters.

    Hidden dims are zero-padded to 128 lanes (exact through matmul/bias/ReLU),
    weights are cast to the MXU compute dtype, biases stay f32.  Doing this at
    init time removes all per-forward padding / casting traffic.
    compute_dtype=jnp.bfloat16 is recommended on v6e/v7x (f32 accumulation is
    always used).
    """
    assert len(params) == 3, "fused kernel expects exactly 2 hidden layers"
    # TODO(synk): generalize the fused kernel to arbitrary-depth hidden_dims.
    (w1, b1), (w2, b2), (w3, b3) = params
    in_dim, h1 = w1.shape
    h2 = w2.shape[1]
    out_dim = w3.shape[1]
    h1_p = _round_up(h1, _LANE)
    h2_p = _round_up(h2, _LANE)

    def _pad(a, rows, cols, dtype):
        a = jnp.asarray(a, dtype)
        if a.shape == (rows, cols):
            return a
        return jnp.zeros((rows, cols), dtype).at[:a.shape[0], :a.shape[1]].set(a)

    tensors = (
        _pad(w1, in_dim, h1_p, compute_dtype),             # W1 [in_dim, h1_p]
        _pad(b1.reshape(1, -1), 1, h1_p, jnp.float32),     # b1
        _pad(w2, h1_p, h2_p, compute_dtype),               # W2 [h1_p, h2_p]
        _pad(b2.reshape(1, -1), 1, h2_p, jnp.float32),     # b2
        _pad(w3, h2_p, out_dim, compute_dtype),            # W3 [h2_p, out_dim]
        _pad(b3.reshape(1, -1), 1, out_dim, jnp.float32),  # b3
    )
    return {"tensors": tensors,
            "dims": (in_dim, h1_p, h2_p, out_dim),
            "compute_dtype": compute_dtype}


def mlp_forward(x, params, *, vmem_budget_bytes=24 << 20):
    """Fused 3-layer MLP forward.  x: [B, input_dim].

    `params` is either the packed dict from `prepare_mlp_params` (preferred:
    zero per-call packing cost) or the raw [(W, b), ...] list.
    """
    if not isinstance(params, dict):
        params = prepare_mlp_params(params)
    w1_p, b1_p, w2_p, b2_p, w3_p, b3_p = params["tensors"]
    in_dim, h1_p, h2_p, out_dim = params["dims"]
    compute_dtype = params["compute_dtype"]

    B = x.shape[0]
    assert x.shape[1] == in_dim
    cs = jnp.dtype(compute_dtype).itemsize
    f32s = 4

    # ---- batch tile selection (VMEM-budgeted) ------------------------------
    def _fits(tile):
        x_bytes = 2 * tile * in_dim * cs                      # double-buffered x
        o_bytes = 2 * tile * out_dim * f32s                   # double-buffered out
        w_bytes = 2 * (cs * (in_dim * h1_p + h1_p * h2_p + h2_p * out_dim)
                       + f32s * (h1_p + h2_p + out_dim))      # conservative 2x
        act_bytes = (f32s * tile * (h1_p + h2_p + out_dim)    # live f32 dot outs
                     + cs * tile * max(h1_p, h2_p))           # compute-dtype copy
        return x_bytes + o_bytes + w_bytes + act_bytes <= vmem_budget_bytes

    if B <= _LANE:
        # Tiny batch: exact 8-multiple tile, single grid step, no batch padding.
        tile_b = _round_up(max(B, _SUBLANE), _SUBLANE)
    else:
        tile_b = 128
        for cand in (1024, 512, 256, 128):                    # grow toward HBM roofline
            if cand <= _round_up(B, 128) and _fits(cand):
                tile_b = cand
                break
        while tile_b > 128 and pl.cdiv(B, tile_b) < 2:        # >=2 steps: both v7x TCs
            tile_b //= 2
    # TODO(synk): add a hidden-dim grid axis for very wide layers where even a
    # 128-row batch tile does not fit the VMEM budget.

    B_p = _round_up(B, tile_b)
    grid = (B_p // tile_b,)

    x_c = x.astype(compute_dtype)
    if B_p != B:
        x_c = jnp.pad(x_c, ((0, B_p - B), (0, 0)))

    flops = 2 * B_p * (in_dim * h1_p + h1_p * h2_p + h2_p * out_dim)
    bytes_accessed = (cs * (B_p * in_dim + in_dim * h1_p + h1_p * h2_p
                            + h2_p * out_dim)
                      + f32s * (B_p * out_dim + h1_p + h2_p + out_dim))

    def _make_call(weight_mode):
        def wspec(shape):
            # Weights/biases: whole-array block, constant index map -> fetched
            # once and VMEM-resident for the whole grid.
            if weight_mode is None:
                return pl.BlockSpec(shape, lambda i: (0, 0))
            return pl.BlockSpec(shape, lambda i: (0, 0), pipeline_mode=weight_mode)

        in_specs = [
            pl.BlockSpec((tile_b, in_dim), lambda i: (i, 0)),  # x tile (pipelined)
            wspec((in_dim, h1_p)), wspec((1, h1_p)),           # W1, b1
            wspec((h1_p, h2_p)), wspec((1, h2_p)),             # W2, b2
            wspec((h2_p, out_dim)), wspec((1, out_dim)),       # W3, b3
        ]
        out_specs = pl.BlockSpec((tile_b, out_dim), lambda i: (i, 0))
        return pl.pallas_call(
            functools.partial(_mlp_kernel, compute_dtype=compute_dtype),
            out_shape=jax.ShapeDtypeStruct((B_p, out_dim), x.dtype),
            grid=grid,
            in_specs=in_specs,
            out_specs=out_specs,
            compiler_params=pltpu.CompilerParams(
                dimension_semantics=("parallel",),
                vmem_limit_bytes=int(min(vmem_budget_bytes + (8 << 20),
                                         128 << 20)),
            ),
            cost_estimate=pl.CostEstimate(
                flops=flops, transcendentals=0, bytes_accessed=bytes_accessed),
        )

    args = (x_c, w1_p, b1_p, w2_p, b2_p, w3_p, b3_p)
    try:
        # Grid-invariant weights: single-buffer them (halves their VMEM
        # footprint; matters most on v7x's 64 MiB VMEM).
        out_padded = _make_call(pl.Buffered(1))(*args)
    except Exception:
        # Fallback for JAX versions without BlockSpec pipeline_mode support.
        out_padded = _make_call(None)(*args)

    return out_padded if B_p == B else out_padded[:B]


def init_mlp_params(key, input_dim, hidden_dims, output_dim=1):
    """Deterministic parameter init (uniform, torch-default-like scale)."""
    params = []
    dims = [input_dim] + list(hidden_dims) + [output_dim]
    for i in range(len(dims) - 1):
        key, kw, kb = jax.random.split(key, 3)
        bound = 1.0 / jnp.sqrt(dims[i])
        # Stored as [in_dim, out_dim] (transpose of torch's [out, in]).
        w = jax.random.uniform(kw, (dims[i], dims[i + 1]),
                               minval=-bound, maxval=bound, dtype=jnp.float32)
        b = jax.random.uniform(kb, (1, dims[i + 1]),
                               minval=-bound, maxval=bound, dtype=jnp.float32)
        params.append((w, b))
    return params


def mlp_reference(x, params):
    """Pure-JAX reference for correctness checking."""
    (w1, b1), (w2, b2), (w3, b3) = params
    h = jnp.maximum(x @ w1 + b1, 0.0)
    h = jnp.maximum(h @ w2 + b2, 0.0)
    return h @ w3 + b3


if __name__ == "__main__":
    key = jax.random.PRNGKey(0)
    input_dim, hidden_dims, output_dim = 16, [32, 32], 1
    batch = 16

    kx, kp = jax.random.split(key)
    x = jax.random.normal(kx, (batch, input_dim), dtype=jnp.float32)
    params = init_mlp_params(kp, input_dim, hidden_dims, output_dim)
    ref = mlp_reference(x, params)

    # f32 MXU path -- bitwise-comparable to the reference.
    packed_f32 = prepare_mlp_params(params, compute_dtype=jnp.float32)
    out = jax.block_until_ready(mlp_forward(x, packed_f32))
    assert out.shape == (batch, output_dim)
    assert jnp.allclose(out, ref, atol=1e-5, rtol=1e-5)

    # bf16-operand / f32-accumulate path (recommended on v6e / v7x).
    packed_bf16 = prepare_mlp_params(params, compute_dtype=jnp.bfloat16)
    out_bf16 = jax.block_until_ready(mlp_forward(x, packed_bf16))
    assert out_bf16.shape == (batch, output_dim)
    assert jnp.allclose(out_bf16, ref, atol=1e-1, rtol=1e-1)

    print("KERNEL_OK")
</pallas_src>

<mosaic_0001>
module attributes {stable_mosaic.version = 11 : i64} {
  func.func @_mlp_kernel(%arg0: i32, %arg1: memref<16x16xf32, #tpu.memory_space<vmem>>, %arg2: memref<16x128xf32, #tpu.memory_space<vmem>>, %arg3: memref<1x128xf32, #tpu.memory_space<vmem>>, %arg4: memref<128x128xf32, #tpu.memory_space<vmem>>, %arg5: memref<1x128xf32, #tpu.memory_space<vmem>>, %arg6: memref<128x1xf32, #tpu.memory_space<vmem>>, %arg7: memref<1x1xf32, #tpu.memory_space<vmem>>, %arg8: memref<16x1xf32, #tpu.memory_space<vmem>>) attributes {dimension_semantics = [#tpu.dimension_semantics<parallel>], iteration_bounds = array<i64: 1>, scalar_prefetch = 0 : i64, scratch_operands = 0 : i64, tpu.core_type = #tpu.core_type<tc>, window_params = [{transform_indices = @transform_0, window_bounds = array<i64: 16, 16>}, {pipeline_mode = #tpu.pipeline_mode<synchronous>, transform_indices = @transform_1, window_bounds = array<i64: 16, 128>}, {pipeline_mode = #tpu.pipeline_mode<synchronous>, transform_indices = @transform_2, window_bounds = array<i64: 1, 128>}, {pipeline_mode = #tpu.pipeline_mode<synchronous>, transform_indices = @transform_3, window_bounds = array<i64: 128, 128>}, {pipeline_mode = #tpu.pipeline_mode<synchronous>, transform_indices = @transform_4, window_bounds = array<i64: 1, 128>}, {pipeline_mode = #tpu.pipeline_mode<synchronous>, transform_indices = @transform_5, window_bounds = array<i64: 128, 1>}, {pipeline_mode = #tpu.pipeline_mode<synchronous>, transform_indices = @transform_6, window_bounds = array<i64: 1, 1>}, {transform_indices = @transform_7, window_bounds = array<i64: 16, 1>}]} {
    %c0 = arith.constant 0 : index
    %c0_0 = arith.constant 0 : index
    %0 = vector.load %arg1[%c0, %c0_0] : memref<16x16xf32, #tpu.memory_space<vmem>>, vector<16x16xf32>
    %c0_1 = arith.constant 0 : index
    %c0_2 = arith.constant 0 : index
    %1 = vector.load %arg2[%c0_1, %c0_2] : memref<16x128xf32, #tpu.memory_space<vmem>>, vector<16x128xf32>
    %cst = arith.constant dense<0.000000e+00> : vector<16x128xf32>
    %2 = tpu.matmul %0, %1, %cst {dimension_numbers = #tpu.dot_dimension_numbers<[1], [0], [0], [1], [0, 0, 1, 1], [], []>} : vector<16x16xf32>, vector<16x128xf32>, vector<16x128xf32> -> vector<16x128xf32>
    %c0_3 = arith.constant 0 : index
    %c0_4 = arith.constant 0 : index
    %3 = vector.load %arg3[%c0_3, %c0_4] : memref<1x128xf32, #tpu.memory_space<vmem>>, vector<1x128xf32>
    %4 = vector.broadcast %3 : vector<1x128xf32> to vector<16x128xf32>
    %5 = arith.addf %2, %4 : vector<16x128xf32>
    %cst_5 = arith.constant 0.000000e+00 : f32
    %6 = vector.broadcast %cst_5 : f32 to vector<16x128xf32>
    %7 = arith.maximumf %5, %6 : vector<16x128xf32>
    %c0_6 = arith.constant 0 : index
    %c0_7 = arith.constant 0 : index
    %8 = vector.load %arg4[%c0_6, %c0_7] : memref<128x128xf32, #tpu.memory_space<vmem>>, vector<128x128xf32>
    %cst_8 = arith.constant dense<0.000000e+00> : vector<16x128xf32>
    %9 = tpu.matmul %7, %8, %cst_8 {dimension_numbers = #tpu.dot_dimension_numbers<[1], [0], [0], [1], [0, 0, 1, 1], [], []>} : vector<16x128xf32>, vector<128x128xf32>, vector<16x128xf32> -> vector<16x128xf32>
    %c0_9 = arith.constant 0 : index
    %c0_10 = arith.constant 0 : index
    %10 = vector.load %arg5[%c0_9, %c0_10] : memref<1x128xf32, #tpu.memory_space<vmem>>, vector<1x128xf32>
    %11 = vector.broadcast %10 : vector<1x128xf32> to vector<16x128xf32>
    %12 = arith.addf %9, %11 : vector<16x128xf32>
    %cst_11 = arith.constant 0.000000e+00 : f32
    %13 = vector.broadcast %cst_11 : f32 to vector<16x128xf32>
    %14 = arith.maximumf %12, %13 : vector<16x128xf32>
    %c0_12 = arith.constant 0 : index
    %c0_13 = arith.constant 0 : index
    %15 = vector.load %arg6[%c0_12, %c0_13] : memref<128x1xf32, #tpu.memory_space<vmem>>, vector<128x1xf32>
    %cst_14 = arith.constant dense<0.000000e+00> : vector<16x1xf32>
    %16 = tpu.matmul %14, %15, %cst_14 {dimension_numbers = #tpu.dot_dimension_numbers<[1], [0], [0], [1], [0, 0, 1, 1], [], []>} : vector<16x128xf32>, vector<128x1xf32>, vector<16x1xf32> -> vector<16x1xf32>
    %c0_15 = arith.constant 0 : index
    %c0_16 = arith.constant 0 : index
    %17 = vector.load %arg7[%c0_15, %c0_16] : memref<1x1xf32, #tpu.memory_space<vmem>>, vector<1x1xf32>
    %18 = vector.broadcast %17 : vector<1x1xf32> to vector<16x1xf32>
    %19 = arith.addf %16, %18 : vector<16x1xf32>
    %c0_17 = arith.constant 0 : index
    %c0_18 = arith.constant 0 : index
    %20 = vector.load %arg8[%c0_17, %c0_18] : memref<16x1xf32, #tpu.memory_space<vmem>>, vector<16x1xf32>
    tpu.vector_store %arg8[%c0_17, %c0_18], %19 {strides = array<i32>} : memref<16x1xf32, #tpu.memory_space<vmem>>, vector<16x1xf32>,
    return
  }
  func.func @transform_0(%arg0: i32) -> (i32, i32) {
    %c0_i32 = arith.constant 0 : i32
    %c0_i32_0 = arith.constant 0 : i32
    return %arg0, %c0_i32 : i32, i32
  }
  func.func @transform_1(%arg0: i32) -> (i32, i32) {
    %c0_i32 = arith.constant 0 : i32
    %c0_i32_0 = arith.constant 0 : i32
    %c0_i32_1 = arith.constant 0 : i32
    return %c0_i32, %c0_i32_0 : i32, i32
  }
  func.func @transform_2(%arg0: i32) -> (i32, i32) {
    %c0_i32 = arith.constant 0 : i32
    %c0_i32_0 = arith.constant 0 : i32
    %c0_i32_1 = arith.constant 0 : i32
    return %c0_i32, %c0_i32_0 : i32, i32
  }
  func.func @transform_3(%arg0: i32) -> (i32, i32) {
    %c0_i32 = arith.constant 0 : i32
    %c0_i32_0 = arith.constant 0 : i32
    %c0_i32_1 = arith.constant 0 : i32
    return %c0_i32, %c0_i32_0 : i32, i32
  }
  func.func @transform_4(%arg0: i32) -> (i32, i32) {
    %c0_i32 = arith.constant 0 : i32
    %c0_i32_0 = arith.constant 0 : i32
    %c0_i32_1 = arith.constant 0 : i32
    return %c0_i32, %c0_i32_0 : i32, i32
  }
  func.func @transform_5(%arg0: i32) -> (i32, i32) {
    %c0_i32 = arith.constant 0 : i32
    %c0_i32_0 = arith.constant 0 : i32
    %c0_i32_1 = arith.constant 0 : i32
    return %c0_i32, %c0_i32_0 : i32, i32
  }
  func.func @transform_6(%arg0: i32) -> (i32, i32) {
    %c0_i32 = arith.constant 0 : i32
    %c0_i32_0 = arith.constant 0 : i32
    %c0_i32_1 = arith.constant 0 : i32
    return %c0_i32, %c0_i32_0 : i32, i32
  }
  func.func @transform_7(%arg0: i32) -> (i32, i32) {
    %c0_i32 = arith.constant 0 : i32
    %c0_i32_0 = arith.constant 0 : i32
    return %arg0, %c0_i32 : i32, i32
  }
}

module attributes {stable_mosaic.version = 11 : i64} {
  func.func @_mlp_kernel(%arg0: i32, %arg1: memref<16x16xf32, #tpu.memory_space<vmem>>, %arg2: memref<16x128xf32, #tpu.memory_space<vmem>>, %arg3: memref<1x128xf32, #tpu.memory_space<vmem>>, %arg4: memref<128x128xf32, #tpu.memory_space<vmem>>, %arg5: memref<1x128xf32, #tpu.memory_space<vmem>>, %arg6: memref<128x1xf32, #tpu.memory_space<vmem>>, %arg7: memref<1x1xf32, #tpu.memory_space<vmem>>, %arg8: memref<16x1xf32, #tpu.memory_space<vmem>>) attributes {dimension_semantics = [#tpu.dimension_semantics<parallel>], iteration_bounds = array<i64: 1>, scalar_prefetch = 0 : i64, scratch_operands = 0 : i64, tpu.core_type = #tpu.core_type<tc>, window_params = [{transform_indices = @transform_0, window_bounds = array<i64: 16, 16>}, {pipeline_mode = #tpu.pipeline_mode<synchronous>, transform_indices = @transform_1, window_bounds = array<i64: 16, 128>}, {pipeline_mode = #tpu.pipeline_mode<synchronous>, transform_indices = @transform_2, window_bounds = array<i64: 1, 128>}, {pipeline_mode = #tpu.pipeline_mode<synchronous>, transform_indices = @transform_3, window_bounds = array<i64: 128, 128>}, {pipeline_mode = #tpu.pipeline_mode<synchronous>, transform_indices = @transform_4, window_bounds = array<i64: 1, 128>}, {pipeline_mode = #tpu.pipeline_mode<synchronous>, transform_indices = @transform_5, window_bounds = array<i64: 128, 1>}, {pipeline_mode = #tpu.pipeline_mode<synchronous>, transform_indices = @transform_6, window_bounds = array<i64: 1, 1>}, {transform_indices = @transform_7, window_bounds = array<i64: 16, 1>}]} {
    %c0 = arith.constant 0 : index
    %c0_0 = arith.constant 0 : index
    %0 = vector.load %arg1[%c0, %c0_0] : memref<16x16xf32, #tpu.memory_space<vmem>>, vector<16x16xf32>
    %c0_1 = arith.constant 0 : index
    %c0_2 = arith.constant 0 : index
    %1 = vector.load %arg2[%c0_1, %c0_2] : memref<16x128xf32, #tpu.memory_space<vmem>>, vector<16x128xf32>
    %cst = arith.constant dense<0.000000e+00> : vector<16x128xf32>
    %2 = tpu.matmul %0, %1, %cst {dimension_numbers = #tpu.dot_dimension_numbers<[1], [0], [0], [1], [0, 0, 1, 1], [], []>} : vector<16x16xf32>, vector<16x128xf32>, vector<16x128xf32> -> vector<16x128xf32>
    %c0_3 = arith.constant 0 : index
    %c0_4 = arith.constant 0 : index
    %3 = vector.load %arg3[%c0_3, %c0_4] : memref<1x128xf32, #tpu.memory_space<vmem>>, vector<1x128xf32>
    %4 = vector.broadcast %3 : vector<1x128xf32> to vector<16x128xf32>
    %5 = arith.addf %2, %4 : vector<16x128xf32>
    %cst_5 = arith.constant 0.000000e+00 : f32
    %6 = vector.broadcast %cst_5 : f32 to vector<16x128xf32>
    %7 = arith.maximumf %5, %6 : vector<16x128xf32>
    %c0_6 = arith.constant 0 : index
    %c0_7 = arith.constant 0 : index
    %8 = vector.load %arg4[%c0_6, %c0_7] : memref<128x128xf32, #tpu.memory_space<vmem>>, vector<128x128xf32>
    %cst_8 = arith.constant dense<0.000000e+00> : vector<16x128xf32>
    %9 = tpu.matmul %7, %8, %cst_8 {dimension_numbers = #tpu.dot_dimension_numbers<[1], [0], [0], [1], [0, 0, 1, 1], [], []>} : vector<16x128xf32>, vector<128x128xf32>, vector<16x128xf32> -> vector<16x128xf32>
    %c0_9 = arith.constant 0 : index
    %c0_10 = arith.constant 0 : index
    %10 = vector.load %arg5[%c0_9, %c0_10] : memref<1x128xf32, #tpu.memory_space<vmem>>, vector<1x128xf32>
    %11 = vector.broadcast %10 : vector<1x128xf32> to vector<16x128xf32>
    %12 = arith.addf %9, %11 : vector<16x128xf32>
    %cst_11 = arith.constant 0.000000e+00 : f32
    %13 = vector.broadcast %cst_11 : f32 to vector<16x128xf32>
    %14 = arith.maximumf %12, %13 : vector<16x128xf32>
    %c0_12 = arith.constant 0 : index
    %c0_13 = arith.constant 0 : index
    %15 = vector.load %arg6[%c0_12, %c0_13] : memref<128x1xf32, #tpu.memory_space<vmem>>, vector<128x1xf32>
    %cst_14 = arith.constant dense<0.000000e+00> : vector<16x1xf32>
    %16 = tpu.matmul %14, %15, %cst_14 {dimension_numbers = #tpu.dot_dimension_numbers<[1], [0], [0], [1], [0, 0, 1, 1], [], []>} : vector<16x128xf32>, vector<128x1xf32>, vector<16x1xf32> -> vector<16x1xf32>
    %c0_15 = arith.constant 0 : index
    %c0_16 = arith.constant 0 : index
    %17 = vector.load %arg7[%c0_15, %c0_16] : memref<1x1xf32, #tpu.memory_space<vmem>>, vector<1x1xf32>
    %18 = vector.broadcast %17 : vector<1x1xf32> to vector<16x1xf32>
    %19 = arith.addf %16, %18 : vector<16x1xf32>
    %c0_17 = arith.constant 0 : index
    %c0_18 = arith.constant 0 : index
    %20 = vector.load %arg8[%c0_17, %c0_18] : memref<16x1xf32, #tpu.memory_space<vmem>>, vector<16x1xf32>
    tpu.vector_store %arg8[%c0_17, %c0_18], %19 {strides = array<i32>} : memref<16x1xf32, #tpu.memory_space<vmem>>, vector<16x1xf32>,
    return
  }
  func.func @transform_0(%arg0: i32) -> (i32, i32) {
    %c0_i32 = arith.constant 0 : i32
    %c0_i32_0 = arith.constant 0 : i32
    return %arg0, %c0_i32 : i32, i32
  }
  func.func @transform_1(%arg0: i32) -> (i32, i32) {
    %c0_i32 = arith.constant 0 : i32
    %c0_i32_0 = arith.constant 0 : i32
    %c0_i32_1 = arith.constant 0 : i32
    return %c0_i32, %c0_i32_0 : i32, i32
  }
  func.func @transform_2(%arg0: i32) -> (i32, i32) {
    %c0_i32 = arith.constant 0 : i32
    %c0_i32_0 = arith.constant 0 : i32
    %c0_i32_1 = arith.constant 0 : i32
    return %c0_i32, %c0_i32_0 : i32, i32
  }
  func.func @transform_3(%arg0: i32) -> (i32, i32) {
    %c0_i32 = arith.constant 0 : i32
    %c0_i32_0 = arith.constant 0 : i32
    %c0_i32_1 = arith.constant 0 : i32
    return %c0_i32, %c0_i32_0 : i32, i32
  }
  func.func @transform_4(%arg0: i32) -> (i32, i32) {
    %c0_i32 = arith.constant 0 : i32
    %c0_i32_0 = arith.constant 0 : i32
    %c0_i32_1 = arith.constant 0 : i32
    return %c0_i32, %c0_i32_0 : i32, i32
  }
  func.func @transform_5(%arg0: i32) -> (i32, i32) {
    %c0_i32 = arith.constant 0 : i32
    %c0_i32_0 = arith.constant 0 : i32
    %c0_i32_1 = arith.constant 0 : i32
    return %c0_i32, %c0_i32_0 : i32, i32
  }
  func.func @transform_6(%arg0: i32) -> (i32, i32) {
    %c0_i32 = arith.constant 0 : i32
    %c0_i32_0 = arith.constant 0 : i32
    %c0_i32_1 = arith.constant 0 : i32
    return %c0_i32, %c0_i32_0 : i32, i32
  }
  func.func @transform_7(%arg0: i32) -> (i32, i32) {
    %c0_i32 = arith.constant 0 : i32
    %c0_i32_0 = arith.constant 0 : i32
    return %arg0, %c0_i32 : i32, i32
  }
}

</mosaic_0001>

<bundles_post_ra>
// kernel: tpu_custom_call.1
= control target key start
LH: loop header
LB: loop body
LE: loop exit
PB: predicated region body
PF: predicated region fallthrough
CT: control target
= control target key end

     0   :  { %s691_s0 = inlined_call_operand.hbm [shape: f32[16,16], index: 0, kind: input, shape index: {}]   ;;  %s692_s1 = inlined_call_operand.hbm [shape: f32[16,128], index: 1, kind: input, shape index: {}]   ;;  %s693_s2 = inlined_call_operand.vmem [shape: f32[1,128], index: 2, kind: input, shape index: {}]   ;;  %s694_s3 = inlined_call_operand.vmem [shape: f32[128,128], index: 3, kind: input, shape index: {}]   ;;  %s695_s4 = inlined_call_operand.vmem [shape: f32[1,128], index: 4, kind: input, shape index: {}]   ;;  %s696_s5 = inlined_call_operand.vmem [shape: f32[128,1], index: 5, kind: input, shape index: {}]   ;;  %s697_s6 = inlined_call_operand.<no memory space> [shape: f32[1,1], index: 6, kind: input, shape index: {}]   ;;  %s698_s7 = inlined_call_operand.vmem [shape: f32[16,1], index: 7, kind: output, shape index: {}]  }
   0x1   :  { %v12_v0 = vstv %s697_s6 }
   0x2   :  { %13 = vst [vmem:[#allocation2] sm:$0x1] %v12_v0 }
   0x3   :  { %14 = vsyncpa [#allocation4], 0 }
   0x4   :  { %15 = vsyncpa [#allocation6], 0  ;;  %s528_s26 = smov [#allocation3]  }
   0x5   :  { %s21_s27 = sshll.u32 %s528_s26, 4  ;;  %s22_s27 = int_to_ptr.vmem [resolvable:$true] %s21_s27 }
   0x6   :  { %s492_s28 = scalar_lea.vmem %s22_s27, 256  ;;  %p497_p1 = scmp.lt.s32.totalorder %s22_s27, %s22_s27 }
   0x7   :  { %p493_p0 = scmp.ne.s32.totalorder %s22_s27, %s492_s28  ;;  %p498_p2 = scmp.lt.s32.totalorder %s492_s28, %s492_s28 }
   0x9   :  { %p499_p3 = por %p498_p2, %p497_p1 }
   0xb   :  { %p500_p4 = pnand %p499_p3, %p493_p0 }
   0xd   :  { %503 = shalt.err (!%p500_p4)
}
   0xe   :  { %s529_s29 = smov 128   ;;  %s530_s30 = smov 8  }
   0xf   :  { %27 = dma.hbm_to_vmem [thread:$0]  %s691_s0, 256, %s22_s27, [#allocation4], %s529_s29, %s529_s29, %s530_s30  }
  0x10   :  { %s531_s6 = smov [#allocation5]  }
  0x11   :  { %s33_s10 = sshll.u32 %s531_s6, 4  ;;  %s34_s10 = int_to_ptr.vmem [resolvable:$true] %s33_s10 }
  0x12   :  { %s512_s11 = scalar_lea.vmem %s34_s10, 256  ;;  %p517_p6 = scmp.lt.s32.totalorder %s34_s10, %s34_s10 }
  0x13   :  { %p513_p5 = scmp.ne.s32.totalorder %s34_s10, %s512_s11  ;;  %p518_p7 = scmp.lt.s32.totalorder %s512_s11, %s512_s11 }
  0x15   :  { %p519_p8 = por %p518_p7, %p517_p6 }
  0x17   :  { %p520_p9 = pnand %p519_p8, %p513_p5 }
  0x19   :  { %523 = shalt.err (!%p520_p9)
}
  0x1a   :  { %39 = dma.hbm_to_vmem [thread:$0]  %s692_s1, 256, %s34_s10, [#allocation6], %s529_s29, %s529_s29, %s530_s30  }
  0x1b   :  { %524 = dma.done.wait [#allocation4], 256  }
  0x1c   :  { %525 = vsyncadd [#allocation4], 4294967040 }
  0x1d   :  { %526 = dma.done.wait [#allocation6], 256  }
  0x1e   :  { %527 = vsyncadd [#allocation6], 4294967040  ;;  %vm67_vm0 = vcmask 130048   ;;  %v59_v1 = vld [vmem:[#allocation5 + $0x8] sm:$0xff]  ;;  %v58_v2 = vld [vmem:[#allocation5] sm:$0xff]  ;;  %vm349_vm1 = vcmask 7168  }
  0x1f   :  { %v56_v3 = vld [vmem:[#allocation3] sm:$0xff]  ;;  %403 = vmatprep.subr.mxu0 %v59_v1  ;;  %v166_v4 = vld [vmem:[%s694_s3 + $0x78] sm:$0xff]  ;;  %v165_v5 = vld [vmem:[%s694_s3 + $0x70] sm:$0xff] }
  0x20   :  { %407 = vmatprep.mubr.msk.f32.mxu0 %vm67_vm0, %v56_v3  ;;  %404 = vmatpush3.msra.mxu0 %v59_v1  ;;  %v57_v6 = vld [vmem:[#allocation3 + $0x8] sm:$0xff]  ;;  %v163_v8 = vld [vmem:[%s694_s3 + $0x60] sm:$0xff]  ;;  %v162_v9 = vld [vmem:[%s694_s3 + $0x58] sm:$0xff] }
  0x21   :  { %410 = vmatprep.subr.mxu1 %v166_v4  ;;  %405 = vmatprep.subr.mxu0 %v58_v2  ;;  %v164_v7 = vld [vmem:[%s694_s3 + $0x68] sm:$0xff]  ;;  %v161_v10 = vld [vmem:[%s694_s3 + $0x50] sm:$0xff]  ;;  %v159_v12 = vld [vmem:[%s694_s3 + $0x40] sm:$0xff] }
  0x22   :  { %411 = vmatpush3.msra.mxu1 %v166_v4  ;;  %406 = vmatpush3.msra.mxu0 %v58_v2  ;;  %v160_v11 = vld [vmem:[%s694_s3 + $0x48] sm:$0xff]  ;;  %v158_v13 = vld [vmem:[%s694_s3 + $0x38] sm:$0xff]  ;;  %v157_v14 = vld [vmem:[%s694_s3 + $0x30] sm:$0xff] }
  0x23   :  { %412 = vmatprep.subr.mxu1 %v165_v5  ;;  %408 = vmatmul.mubr.msk.f32.vlgmr.msra.gmra.mxu0 %vm67_vm0, %v57_v6  ;;  %v156_v15 = vld [vmem:[%s694_s3 + $0x28] sm:$0xff]  ;;  %v155_v16 = vld [vmem:[%s694_s3 + $0x20] sm:$0xff]  ;;  %v154_v17 = vld [vmem:[%s694_s3 + $0x18] sm:$0xff] }
  0x24   :  { %413 = vmatpush3.msra.mxu1 %v165_v5  ;;  %v153_v18 = vld [vmem:[%s694_s3 + $0x10] sm:$0xff]  ;;  %v152_v19 = vld [vmem:[%s694_s3 + $0x8] sm:$0xff]  ;;  %v151_v20 = vld [vmem:[%s694_s3] sm:$0xff] }
  0x25   :  { %414 = vmatprep.subr.mxu1 %v164_v7  ;;  %v266_v21 = vld [vmem:[%s696_s5 + $0x78] sm:$0xff]  ;;  %v265_v22 = vld [vmem:[%s696_s5 + $0x70] sm:$0xff]  ;;  %v264_v23 = vld [vmem:[%s696_s5 + $0x68] sm:$0xff] }
  0x26   :  { %415 = vmatpush3.msra.mxu1 %v164_v7  ;;  %445 = vmatprep.subr.mxu0 %v266_v21  ;;  %v263_v24 = vld [vmem:[%s696_s5 + $0x60] sm:$0xff]  ;;  %v262_v25 = vld [vmem:[%s696_s5 + $0x58] sm:$0xff]  ;;  %v261_v26 = vld [vmem:[%s696_s5 + $0x50] sm:$0xff] }
  0x27   :  { %416 = vmatprep.subr.mxu1 %v163_v8  ;;  %446 = vmatpush3.msra.mxu0 %v266_v21  ;;  %v260_v27 = vld [vmem:[%s696_s5 + $0x48] sm:$0xff]  ;;  %v259_v28 = vld [vmem:[%s696_s5 + $0x40] sm:$0xff]  ;;  %v258_v29 = vld [vmem:[%s696_s5 + $0x38] sm:$0xff] }
  0x28   :  { %417 = vmatpush3.msra.mxu1 %v163_v8  ;;  %447 = vmatprep.subr.mxu0 %v265_v22  ;;  %v257_v30 = vld [vmem:[%s696_s5 + $0x30] sm:$0xff]  ;;  %v256_v31 = vld [vmem:[%s696_s5 + $0x28] sm:$0xff]  ;;  %v255_v32 = vld [vmem:[%s696_s5 + $0x20] sm:$0xff] }
  0x29   :  { %418 = vmatprep.subr.mxu1 %v162_v9  ;;  %448 = vmatpush3.msra.mxu0 %v265_v22  ;;  %v358_v33 = vld [vmem:[%s693_s2] ss:$0 sm:$0xff]  ;;  %v254_v40 = vld [vmem:[%s696_s5 + $0x18] sm:$0xff]  ;;  %v253_v41 = vld [vmem:[%s696_s5 + $0x10] sm:$0xff] }
  0x2a   :  { %419 = vmatpush3.msra.mxu1 %v162_v9  ;;  %449 = vmatprep.subr.mxu0 %v264_v23  ;;  %v252_v42 = vld [vmem:[%s696_s5 + $0x8] sm:$0xff]  ;;  %v251_v43 = vld [vmem:[%s696_s5] sm:$0xff] }
  0x2b   :  { %420 = vmatprep.subr.mxu1 %v161_v10  ;;  %450 = vmatpush3.msra.mxu0 %v264_v23  ;;  %v361_v44 = vld [vmem:[%s695_s4] ss:$0 sm:$0xff] }
  0x2c   :  { %421 = vmatpush3.msra.mxu1 %v161_v10  ;;  %451 = vmatprep.subr.mxu0 %v263_v24  ;;  %v362_v51 = vld [vmem:[#allocation2] ss:$0 sm:$0xff] }
  0x2d   :  { %422 = vmatprep.subr.mxu1 %v160_v11  ;;  %452 = vmatpush3.msra.mxu0 %v263_v24 }
  0x2e   :  { %423 = vmatpush3.msra.mxu1 %v160_v11  ;;  %453 = vmatprep.subr.mxu0 %v262_v25 }
  0x2f   :  { %424 = vmatprep.subr.mxu1 %v159_v12  ;;  %454 = vmatpush3.msra.mxu0 %v262_v25 }
  0x30   :  { %425 = vmatpush3.msra.mxu1 %v159_v12  ;;  %455 = vmatprep.subr.mxu0 %v261_v26 }
  0x31   :  { %426 = vmatprep.subr.mxu1 %v158_v13  ;;  %456 = vmatpush3.msra.mxu0 %v261_v26 }
  0x32   :  { %427 = vmatpush3.msra.mxu1 %v158_v13  ;;  %457 = vmatprep.subr.mxu0 %v260_v27 }
  0x33   :  { %428 = vmatprep.subr.mxu1 %v157_v14  ;;  %458 = vmatpush3.msra.mxu0 %v260_v27 }
  0x34   :  { %429 = vmatpush3.msra.mxu1 %v157_v14  ;;  %459 = vmatprep.subr.mxu0 %v259_v28 }
  0x35   :  { %430 = vmatprep.subr.mxu1 %v156_v15  ;;  %460 = vmatpush3.msra.mxu0 %v259_v28 }
  0x36   :  { %431 = vmatpush3.msra.mxu1 %v156_v15  ;;  %461 = vmatprep.subr.mxu0 %v258_v29 }
  0x37   :  { %432 = vmatprep.subr.mxu1 %v155_v16  ;;  %462 = vmatpush3.msra.mxu0 %v258_v29 }
  0x38   :  { %433 = vmatpush3.msra.mxu1 %v155_v16  ;;  %463 = vmatprep.subr.mxu0 %v257_v30 }
  0x39   :  { %434 = vmatprep.subr.mxu1 %v154_v17  ;;  %464 = vmatpush3.msra.mxu0 %v257_v30 }
  0x3a   :  { %435 = vmatpush3.msra.mxu1 %v154_v17  ;;  %465 = vmatprep.subr.mxu0 %v256_v31 }
  0x3b   :  { %436 = vmatprep.subr.mxu1 %v153_v18  ;;  %466 = vmatpush3.msra.mxu0 %v256_v31 }
  0x3c   :  { %437 = vmatpush3.msra.mxu1 %v153_v18  ;;  %467 = vmatprep.subr.mxu0 %v255_v32 }
  0x3d   :  { %438 = vmatprep.subr.mxu1 %v152_v19  ;;  %468 = vmatpush3.msra.mxu0 %v255_v32 }
  0x3e   :  { %439 = vmatpush3.msra.mxu1 %v152_v19  ;;  %469 = vmatprep.subr.mxu0 %v254_v40 }
  0x3f   :  { %440 = vmatprep.subr.mxu1 %v151_v20  ;;  %470 = vmatpush3.msra.mxu0 %v254_v40 }
  0x40   :  { %441 = vmatpush3.msra.mxu1 %v151_v20  ;;  %471 = vmatprep.subr.mxu0 %v253_v41 }
  0x41   :  { %472 = vmatpush3.msra.mxu0 %v253_v41 }
  0x42   :  { %473 = vmatprep.subr.mxu0 %v252_v42 }
  0x43   :  { %474 = vmatpush3.msra.mxu0 %v252_v42 }
  0x44   :  { %475 = vmatprep.subr.mxu0 %v251_v43 }
  0x45   :  { %476 = vmatpush3.msra.mxu0 %v251_v43 }
  0xe3   :  { %v409_v34 = vpop.f32.mrf.mxu0 }
  0xe4   :  { %v146_v35 = vadd.f32 %v409_v34, %v358_v33 }
  0xe5   :  { %v140_v36 = vpop.f32.mrf.mxu0 }
  0xe6   :  { %v141_v37 = vadd.f32 %v358_v33, %v140_v36  ;;  %v150_v39 = vmax.f32 %v146_v35, 0.0 }
  0xe8   :  { %v149_v38 = vmax.f32 %v141_v37, 0.0 }
  0xea   :  { %442 = vmatprep.mubr.f32.mxu1 %v149_v38 }
  0xeb   :  { %443 = vmatmul.mubr.f32.vlgmr.msra.gmra.mxu1 %v150_v39 }
 0x1ab   :  { %v444_v45 = vpop.f32.mrf.mxu1 }
 0x1ac   :  { %v246_v46 = vadd.f32 %v444_v45, %v361_v44 }
 0x1ad   :  { %v240_v47 = vpop.f32.mrf.mxu1 }
 0x1ae   :  { %v241_v48 = vadd.f32 %v361_v44, %v240_v47  ;;  %v250_v50 = vmax.f32 %v246_v46, 0.0 }
 0x1b0   :  { %v249_v49 = vmax.f32 %v241_v48, 0.0 }
 0x1b2   :  { %477 = vmatprep.mubr.f32.mxu0 %v249_v49 }
 0x1b3   :  { %478 = vmatmul.mubr.f32.vlgmr.msra.gmra.mxu0 %v250_v50 }
 0x273   :  { %v479_v52 = vpop.f32.mrf.mxu0 }
 0x274   :  { %v346_v53 = vadd.f32 %v479_v52, %v362_v51 }
 0x275   :  { %v340_v54 = vpop.f32.mrf.mxu0 }
 0x276   :  { %351 = vst.msk [vmem:[%s698_s7 + $0x8] sm:$0xff] %vm349_vm1, %v346_v53  ;;  %v341_v55 = vadd.f32 %v362_v51, %v340_v54 }
 0x278   :  { %350 = vst.msk [vmem:[%s698_s7] sm:$0xff] %vm349_vm1, %v341_v55 }
 0x279   :  { %356 = vsyncpa [#allocation4], 1 }
 0x27a   :  { %357 = vsyncpa [#allocation6], 1 }

// kernel: tpu_custom_call.1
= control target key start
LH: loop header
LB: loop body
LE: loop exit
PB: predicated region body
PF: predicated region fallthrough
CT: control target
= control target key end

     0   :  { %s691_s0 = inlined_call_operand.hbm [shape: f32[16,16], index: 0, kind: input, shape index: {}]   ;;  %s692_s1 = inlined_call_operand.hbm [shape: f32[16,128], index: 1, kind: input, shape index: {}]   ;;  %s693_s2 = inlined_call_operand.vmem [shape: f32[1,128], index: 2, kind: input, shape index: {}]   ;;  %s694_s3 = inlined_call_operand.vmem [shape: f32[128,128], index: 3, kind: input, shape index: {}]   ;;  %s695_s4 = inlined_call_operand.vmem [shape: f32[1,128], index: 4, kind: input, shape index: {}]   ;;  %s696_s5 = inlined_call_operand.vmem [shape: f32[128,1], index: 5, kind: input, shape index: {}]   ;;  %s697_s6 = inlined_call_operand.<no memory space> [shape: f32[1,1], index: 6, kind: input, shape index: {}]   ;;  %s698_s7 = inlined_call_operand.vmem [shape: f32[16,1], index: 7, kind: output, shape index: {}]  }
   0x1   :  { %v12_v0 = vstv %s697_s6 }
   0x2   :  { %13 = vst [vmem:[#allocation2] sm:$0x1] %v12_v0 }
   0x3   :  { %14 = vsyncpa [#allocation4], 0 }
   0x4   :  { %15 = vsyncpa [#allocation6], 0  ;;  %s528_s26 = smov [#allocation3]  }
   0x5   :  { %s21_s27 = sshll.u32 %s528_s26, 4  ;;  %s22_s27 = int_to_ptr.vmem [resolvable:$true] %s21_s27 }
   0x6   :  { %s492_s28 = scalar_lea.vmem %s22_s27, 256  ;;  %p497_p1 = scmp.lt.s32.totalorder %s22_s27, %s22_s27 }
   0x7   :  { %p493_p0 = scmp.ne.s32.totalorder %s22_s27, %s492_s28  ;;  %p498_p2 = scmp.lt.s32.totalorder %s492_s28, %s492_s28 }
   0x9   :  { %p499_p3 = por %p498_p2, %p497_p1 }
   0xb   :  { %p500_p4 = pnand %p499_p3, %p493_p0 }
   0xd   :  { %503 = shalt.err (!%p500_p4)
}
   0xe   :  { %s529_s29 = smov 128   ;;  %s530_s30 = smov 8  }
   0xf   :  { %27 = dma.hbm_to_vmem [thread:$0]  %s691_s0, 256, %s22_s27, [#allocation4], %s529_s29, %s529_s29, %s530_s30  }
  0x10   :  { %s531_s6 = smov [#allocation5]  }
  0x11   :  { %s33_s10 = sshll.u32 %s531_s6, 4  ;;  %s34_s10 = int_to_ptr.vmem [resolvable:$true] %s33_s10 }
  0x12   :  { %s512_s11 = scalar_lea.vmem %s34_s10, 256  ;;  %p517_p6 = scmp.lt.s32.totalorder %s34_s10, %s34_s10 }
  0x13   :  { %p513_p5 = scmp.ne.s32.totalorder %s34_s10, %s512_s11  ;;  %p518_p7 = scmp.lt.s32.totalorder %s512_s11, %s512_s11 }
  0x15   :  { %p519_p8 = por %p518_p7, %p517_p6 }
  0x17   :  { %p520_p9 = pnand %p519_p8, %p513_p5 }
  0x19   :  { %523 = shalt.err (!%p520_p9)
}
  0x1a   :  { %39 = dma.hbm_to_vmem [thread:$0]  %s692_s1, 256, %s34_s10, [#allocation6], %s529_s29, %s529_s29, %s530_s30  }
  0x1b   :  { %524 = dma.done.wait [#allocation4], 256  }
  0x1c   :  { %525 = vsyncadd [#allocation4], 4294967040 }
  0x1d   :  { %526 = dma.done.wait [#allocation6], 256  }
  0x1e   :  { %527 = vsyncadd [#allocation6], 4294967040  ;;  %vm67_vm0 = vcmask 130048   ;;  %v59_v1 = vld [vmem:[#allocation5 + $0x8] sm:$0xff]  ;;  %v58_v2 = vld [vmem:[#allocation5] sm:$0xff]  ;;  %vm349_vm1 = vcmask 7168  }
  0x1f   :  { %v56_v3 = vld [vmem:[#allocation3] sm:$0xff]  ;;  %403 = vmatprep.subr.mxu0 %v59_v1  ;;  %v166_v4 = vld [vmem:[%s694_s3 + $0x78] sm:$0xff]  ;;  %v165_v5 = vld [vmem:[%s694_s3 + $0x70] sm:$0xff] }
  0x20   :  { %407 = vmatprep.mubr.msk.f32.mxu0 %vm67_vm0, %v56_v3  ;;  %404 = vmatpush3.msra.mxu0 %v59_v1  ;;  %v57_v6 = vld [vmem:[#allocation3 + $0x8] sm:$0xff]  ;;  %v163_v8 = vld [vmem:[%s694_s3 + $0x60] sm:$0xff]  ;;  %v162_v9 = vld [vmem:[%s694_s3 + $0x58] sm:$0xff] }
  0x21   :  { %410 = vmatprep.subr.mxu1 %v166_v4  ;;  %405 = vmatprep.subr.mxu0 %v58_v2  ;;  %v164_v7 = vld [vmem:[%s694_s3 + $0x68] sm:$0xff]  ;;  %v161_v10 = vld [vmem:[%s694_s3 + $0x50] sm:$0xff]  ;;  %v159_v12 = vld [vmem:[%s694_s3 + $0x40] sm:$0xff] }
  0x22   :  { %411 = vmatpush3.msra.mxu1 %v166_v4  ;;  %406 = vmatpush3.msra.mxu0 %v58_v2  ;;  %v160_v11 = vld [vmem:[%s694_s3 + $0x48] sm:$0xff]  ;;  %v158_v13 = vld [vmem:[%s694_s3 + $0x38] sm:$0xff]  ;;  %v157_v14 = vld [vmem:[%s694_s3 + $0x30] sm:$0xff] }
  0x23   :  { %412 = vmatprep.subr.mxu1 %v165_v5  ;;  %408 = vmatmul.mubr.msk.f32.vlgmr.msra.gmra.mxu0 %vm67_vm0, %v57_v6  ;;  %v156_v15 = vld [vmem:[%s694_s3 + $0x28] sm:$0xff]  ;;  %v155_v16 = vld [vmem:[%s694_s3 + $0x20] sm:$0xff]  ;;  %v154_v17 = vld [vmem:[%s694_s3 + $0x18] sm:$0xff] }
  0x24   :  { %413 = vmatpush3.msra.mxu1 %v165_v5  ;;  %v153_v18 = vld [vmem:[%s694_s3 + $0x10] sm:$0xff]  ;;  %v152_v19 = vld [vmem:[%s694_s3 + $0x8] sm:$0xff]  ;;  %v151_v20 = vld [vmem:[%s694_s3] sm:$0xff] }
  0x25   :  { %414 = vmatprep.subr.mxu1 %v164_v7  ;;  %v266_v21 = vld [vmem:[%s696_s5 + $0x78] sm:$0xff]  ;;  %v265_v22 = vld [vmem:[%s696_s5 + $0x70] sm:$0xff]  ;;  %v264_v23 = vld [vmem:[%s696_s5 + $0x68] sm:$0xff] }
  0x26   :  { %415 = vmatpush3.msra.mxu1 %v164_v7  ;;  %445 = vmatprep.subr.mxu0 %v266_v21  ;;  %v263_v24 = vld [vmem:[%s696_s5 + $0x60] sm:$0xff]  ;;  %v262_v25 = vld [vmem:[%s696_s5 + $0x58] sm:$0xff]  ;;  %v261_v26 = vld [vmem:[%s696_s5 + $0x50] sm:$0xff] }
  0x27   :  { %416 = vmatprep.subr.mxu1 %v163_v8  ;;  %446 = vmatpush3.msra.mxu0 %v266_v21  ;;  %v260_v27 = vld [vmem:[%s696_s5 + $0x48] sm:$0xff]  ;;  %v259_v28 = vld [vmem:[%s696_s5 + $0x40] sm:$0xff]  ;;  %v258_v29 = vld [vmem:[%s696_s5 + $0x38] sm:$0xff] }
  0x28   :  { %417 = vmatpush3.msra.mxu1 %v163_v8  ;;  %447 = vmatprep.subr.mxu0 %v265_v22  ;;  %v257_v30 = vld [vmem:[%s696_s5 + $0x30] sm:$0xff]  ;;  %v256_v31 = vld [vmem:[%s696_s5 + $0x28] sm:$0xff]  ;;  %v255_v32 = vld [vmem:[%s696_s5 + $0x20] sm:$0xff] }
  0x29   :  { %418 = vmatprep.subr.mxu1 %v162_v9  ;;  %448 = vmatpush3.msra.mxu0 %v265_v22  ;;  %v358_v33 = vld [vmem:[%s693_s2] ss:$0 sm:$0xff]  ;;  %v254_v40 = vld [vmem:[%s696_s5 + $0x18] sm:$0xff]  ;;  %v253_v41 = vld [vmem:[%s696_s5 + $0x10] sm:$0xff] }
  0x2a   :  { %419 = vmatpush3.msra.mxu1 %v162_v9  ;;  %449 = vmatprep.subr.mxu0 %v264_v23  ;;  %v252_v42 = vld [vmem:[%s696_s5 + $0x8] sm:$0xff]  ;;  %v251_v43 = vld [vmem:[%s696_s5] sm:$0xff] }
  0x2b   :  { %420 = vmatprep.subr.mxu1 %v161_v10  ;;  %450 = vmatpush3.msra.mxu0 %v264_v23  ;;  %v361_v44 = vld [vmem:[%s695_s4] ss:$0 sm:$0xff] }
  0x2c   :  { %421 = vmatpush3.msra.mxu1 %v161_v10  ;;  %451 = vmatprep.subr.mxu0 %v263_v24  ;;  %v362_v51 = vld [vmem:[#allocation2] ss:$0 sm:$0xff] }
  0x2d   :  { %422 = vmatprep.subr.mxu1 %v160_v11  ;;  %452 = vmatpush3.msra.mxu0 %v263_v24 }
  0x2e   :  { %423 = vmatpush3.msra.mxu1 %v160_v11  ;;  %453 = vmatprep.subr.mxu0 %v262_v25 }
  0x2f   :  { %424 = vmatprep.subr.mxu1 %v159_v12  ;;  %454 = vmatpush3.msra.mxu0 %v262_v25 }
  0x30   :  { %425 = vmatpush3.msra.mxu1 %v159_v12  ;;  %455 = vmatprep.subr.mxu0 %v261_v26 }
  0x31   :  { %426 = vmatprep.subr.mxu1 %v158_v13  ;;  %456 = vmatpush3.msra.mxu0 %v261_v26 }
  0x32   :  { %427 = vmatpush3.msra.mxu1 %v158_v13  ;;  %457 = vmatprep.subr.mxu0 %v260_v27 }
  0x33   :  { %428 = vmatprep.subr.mxu1 %v157_v14  ;;  %458 = vmatpush3.msra.mxu0 %v260_v27 }
  0x34   :  { %429 = vmatpush3.msra.mxu1 %v157_v14  ;;  %459 = vmatprep.subr.mxu0 %v259_v28 }
  0x35   :  { %430 = vmatprep.subr.mxu1 %v156_v15  ;;  %460 = vmatpush3.msra.mxu0 %v259_v28 }
  0x36   :  { %431 = vmatpush3.msra.mxu1 %v156_v15  ;;  %461 = vmatprep.subr.mxu0 %v258_v29 }
  0x37   :  { %432 = vmatprep.subr.mxu1 %v155_v16  ;;  %462 = vmatpush3.msra.mxu0 %v258_v29 }
  0x38   :  { %433 = vmatpush3.msra.mxu1 %v155_v16  ;;  %463 = vmatprep.subr.mxu0 %v257_v30 }
  0x39   :  { %434 = vmatprep.subr.mxu1 %v154_v17  ;;  %464 = vmatpush3.msra.mxu0 %v257_v30 }
  0x3a   :  { %435 = vmatpush3.msra.mxu1 %v154_v17  ;;  %465 = vmatprep.subr.mxu0 %v256_v31 }
  0x3b   :  { %436 = vmatprep.subr.mxu1 %v153_v18  ;;  %466 = vmatpush3.msra.mxu0 %v256_v31 }
  0x3c   :  { %437 = vmatpush3.msra.mxu1 %v153_v18  ;;  %467 = vmatprep.subr.mxu0 %v255_v32 }
  0x3d   :  { %438 = vmatprep.subr.mxu1 %v152_v19  ;;  %468 = vmatpush3.msra.mxu0 %v255_v32 }
  0x3e   :  { %439 = vmatpush3.msra.mxu1 %v152_v19  ;;  %469 = vmatprep.subr.mxu0 %v254_v40 }
  0x3f   :  { %440 = vmatprep.subr.mxu1 %v151_v20  ;;  %470 = vmatpush3.msra.mxu0 %v254_v40 }
  0x40   :  { %441 = vmatpush3.msra.mxu1 %v151_v20  ;;  %471 = vmatprep.subr.mxu0 %v253_v41 }
  0x41   :  { %472 = vmatpush3.msra.mxu0 %v253_v41 }
  0x42   :  { %473 = vmatprep.subr.mxu0 %v252_v42 }
  0x43   :  { %474 = vmatpush3.msra.mxu0 %v252_v42 }
  0x44   :  { %475 = vmatprep.subr.mxu0 %v251_v43 }
  0x45   :  { %476 = vmatpush3.msra.mxu0 %v251_v43 }
  0xe3   :  { %v409_v34 = vpop.f32.mrf.mxu0 }
  0xe4   :  { %v146_v35 = vadd.f32 %v409_v34, %v358_v33 }
  0xe5   :  { %v140_v36 = vpop.f32.mrf.mxu0 }
  0xe6   :  { %v141_v37 = vadd.f32 %v358_v33, %v140_v36  ;;  %v150_v39 = vmax.f32 %v146_v35, 0.0 }
  0xe8   :  { %v149_v38 = vmax.f32 %v141_v37, 0.0 }
  0xea   :  { %442 = vmatprep.mubr.f32.mxu1 %v149_v38 }
  0xeb   :  { %443 = vmatmul.mubr.f32.vlgmr.msra.gmra.mxu1 %v150_v39 }
 0x1ab   :  { %v444_v45 = vpop.f32.mrf.mxu1 }
 0x1ac   :  { %v246_v46 = vadd.f32 %v444_v45, %v361_v44 }
 0x1ad   :  { %v240_v47 = vpop.f32.mrf.mxu1 }
 0x1ae   :  { %v241_v48 = vadd.f32 %v361_v44, %v240_v47  ;;  %v250_v50 = vmax.f32 %v246_v46, 0.0 }
 0x1b0   :  { %v249_v49 = vmax.f32 %v241_v48, 0.0 }
 0x1b2   :  { %477 = vmatprep.mubr.f32.mxu0 %v249_v49 }
 0x1b3   :  { %478 = vmatmul.mubr.f32.vlgmr.msra.gmra.mxu0 %v250_v50 }
 0x273   :  { %v479_v52 = vpop.f32.mrf.mxu0 }
 0x274   :  { %v346_v53 = vadd.f32 %v479_v52, %v362_v51 }
 0x275   :  { %v340_v54 = vpop.f32.mrf.mxu0 }
 0x276   :  { %351 = vst.msk [vmem:[%s698_s7 + $0x8] sm:$0xff] %vm349_vm1, %v346_v53  ;;  %v341_v55 = vadd.f32 %v362_v51, %v340_v54 }
 0x278   :  { %350 = vst.msk [vmem:[%s698_s7] sm:$0xff] %vm349_vm1, %v341_v55 }
 0x279   :  { %356 = vsyncpa [#allocation4], 1 }
 0x27a   :  { %357 = vsyncpa [#allocation6], 1 }

</bundles_post_ra>
